<compile_context>
chip_gen: v5e
topology: v5e:2x2
jax: 0.10.0
libtpu: 0.0.40
codegen_flags: <defaults>
</compile_context>

<pallas_src>
import jax
import jax.numpy as jnp
from jax import lax
from jax.experimental import pallas as pl
from jax.experimental.pallas import tpu as pltpu


_LANES = 128
_SUBLANES = 8
_MAX_BLOCK_ROWS = 8192            # upper cap on rows per block (amortizes ~0.35us/step)
_DEFAULT_TILE_BUDGET = 20 << 20   # bytes of VMEM for (double-buffered) tiles
_DEFAULT_VMEM_LIMIT = 32 << 20    # explicit scoped-VMEM limit (safe on v5e/v6e/v7x)


def _round_up(x: int, m: int) -> int:
    return ((x + m - 1) // m) * m


def _vmem_budget():
    """Generation-aware VMEM budget (tile bytes, scoped limit), with a safe fallback."""
    budget, limit = _DEFAULT_TILE_BUDGET, _DEFAULT_VMEM_LIMIT
    try:
        cap = getattr(pltpu.get_tpu_info(), "vmem_capacity_bytes", None)
        if cap:
            limit = min(limit, cap // 2)          # e.g. v7x: 64 MiB physical -> 32 MiB
            budget = min(budget, (limit * 3) // 4)
    except Exception:
        pass
    return budget, limit


# ----------------------------------------------------------------------------------
# Kernel: one row-block of the final (N, num_types) output per grid step.
# ----------------------------------------------------------------------------------
def _one_hot_kernel(types_ref, out_ref):
    # types_ref: (block_n, 1) int32   -- atom type per node (garbage rows past N are
    #                                    never written back: Pallas masks the ragged
    #                                    last block of the output)
    # out_ref:   (block_n, num_types) -- final-layout output tile
    t = types_ref[...]                                             # (block_n, 1)
    cls = lax.broadcasted_iota(jnp.int32, out_ref.shape, 1)        # class ids, in-kernel
    out_ref[...] = (cls == t).astype(out_ref.dtype)


# ----------------------------------------------------------------------------------
# Wrapper
# ----------------------------------------------------------------------------------
def one_hot_atom_encoding(atom_types, num_types, out_dtype, *, max_block_rows=None):
    """One-hot encode atom types to [N, num_types] of dtype `out_dtype` using Pallas."""
    if num_types < 1:
        raise ValueError("num_types must be >= 1")

    # torch's .squeeze(-1): only drops the last dim if it is exactly 1.
    if atom_types.ndim > 1 and atom_types.shape[-1] == 1:
        atom_types = atom_types[..., 0]
    if atom_types.ndim != 1:
        raise ValueError(f"expected 1-D atom types after squeeze, got {atom_types.shape}")

    types = atom_types.astype(jnp.int32)
    n = types.shape[0]
    if n == 0:
        return jnp.zeros((0, num_types), dtype=out_dtype)

    out_itemsize = jnp.dtype(out_dtype).itemsize
    budget, vmem_limit = _vmem_budget()

    # VMEM footprint per row: double-buffered output tile (lanes padded to 128) plus
    # the double-buffered thin types tile (also padded to a full 128-lane vreg row).
    lanes_out = _round_up(num_types, _LANES)
    bytes_per_row = 2 * lanes_out * out_itemsize + 2 * _LANES * 4
    cap = max_block_rows if max_block_rows is not None else _MAX_BLOCK_ROWS
    max_rows = max(_SUBLANES, min(cap, budget // bytes_per_row) // _SUBLANES * _SUBLANES)

    if n <= max_rows:
        # Single block covering the whole array (block dims == full dims is always legal).
        block_n, num_blocks = n, 1
    else:
        block_n = max_rows
        num_blocks = pl.cdiv(n, block_n)
        # Balance v7x's two TensorCores: prefer an even block count (harmless on 1-TC chips).
        if num_blocks > 1 and num_blocks % 2 == 1:
            cand = max(_SUBLANES, _round_up(pl.cdiv(n, num_blocks + 1), _SUBLANES))
            if cand <= max_rows:
                block_n = cand
                num_blocks = pl.cdiv(n, block_n)

    types_col = types[:, None]                      # (N, 1)

    cost = pl.CostEstimate(
        flops=n * num_types,
        transcendentals=0,
        bytes_accessed=n * 4 + n * num_types * out_itemsize,
    )

    out = pl.pallas_call(
        _one_hot_kernel,
        out_shape=jax.ShapeDtypeStruct((n, num_types), out_dtype),
        grid_spec=pltpu.PrefetchScalarGridSpec(
            num_scalar_prefetch=0,
            grid=(num_blocks,),
            in_specs=[pl.BlockSpec((block_n, 1), lambda i: (i, 0))],
            out_specs=pl.BlockSpec((block_n, num_types), lambda i: (i, 0)),
        ),
        compiler_params=pltpu.CompilerParams(
            dimension_semantics=("parallel",),
            vmem_limit_bytes=vmem_limit,
        ),
        cost_estimate=cost,
    )(types_col)
    return out


# ----------------------------------------------------------------------------------
# Module
# ----------------------------------------------------------------------------------
class OneHotAtomEncoding:
    """JAX/Pallas port of nequip's OneHotAtomEncoding module (forward only)."""

    def __init__(self, num_types: int, set_features: bool = True):
        self.num_types = num_types
        self.set_features = set_features
        # No learnable parameters in this module.

    def __call__(self, data: dict) -> dict:
        atom_types = data["atom_types"]
        pos_dtype = data["pos"].dtype
        one_hot = one_hot_atom_encoding(atom_types, self.num_types, pos_dtype)
        data = dict(data)
        data["node_attrs"] = one_hot
        if self.set_features:
            data["node_features"] = one_hot
        return data


if __name__ == "__main__":
    key = jax.random.PRNGKey(0)
    k_types, k_pos = jax.random.split(key)

    num_types = 4
    num_nodes = 16

    atom_types = jax.random.randint(k_types, (num_nodes, 1), 0, num_types, dtype=jnp.int32)
    positions = jax.random.normal(k_pos, (num_nodes, 3), dtype=jnp.float32)

    data = {"atom_types": atom_types, "pos": positions}
    module = OneHotAtomEncoding(num_types=num_types, set_features=True)
    out = module(data)

    node_attrs = jax.block_until_ready(out["node_attrs"])
    node_features = jax.block_until_ready(out["node_features"])

    ref = jax.nn.one_hot(atom_types[:, 0], num_types, dtype=positions.dtype)
    assert node_attrs.shape == (num_nodes, num_types)
    assert node_attrs.dtype == positions.dtype
    assert jnp.array_equal(node_attrs, ref)
    assert jnp.array_equal(node_features, ref)

    # Odd N, num_types that divides nothing nicely (single ragged block).
    t5 = jax.random.randint(jax.random.PRNGKey(1), (37,), 0, 5, dtype=jnp.int32)
    oh5 = jax.block_until_ready(one_hot_atom_encoding(t5, 5, jnp.float32))
    assert jnp.array_equal(oh5, jax.nn.one_hot(t5, 5, dtype=jnp.float32))

    # Force the multi-block path with a ragged last block (exercises Pallas masking).
    oh5b = jax.block_until_ready(one_hot_atom_encoding(t5, 5, jnp.float32, max_block_rows=8))
    assert jnp.array_equal(oh5b, jax.nn.one_hot(t5, 5, dtype=jnp.float32))

    # Wider class dimension + bf16 output dtype.
    t40 = jax.random.randint(jax.random.PRNGKey(2), (19,), 0, 40, dtype=jnp.int32)
    oh40 = jax.block_until_ready(one_hot_atom_encoding(t40, 40, jnp.bfloat16))
    assert jnp.array_equal(oh40.astype(jnp.float32),
                           jax.nn.one_hot(t40, 40, dtype=jnp.float32))

    print("KERNEL_OK")
</pallas_src>

<mosaic_0001>
module attributes {stable_mosaic.version = 11 : i64} {
  func.func @_one_hot_kernel(%arg0: i32, %arg1: memref<16x1xi32, #tpu.memory_space<vmem>>, %arg2: memref<16x4xf32, #tpu.memory_space<vmem>>) attributes {dimension_semantics = [#tpu.dimension_semantics<parallel>], iteration_bounds = array<i64: 1>, scalar_prefetch = 0 : i64, scratch_operands = 0 : i64, tpu.core_type = #tpu.core_type<tc>, window_params = [{transform_indices = @transform_0, window_bounds = array<i64: 16, 1>}, {transform_indices = @transform_1, window_bounds = array<i64: 16, 4>}]} {
    %c0 = arith.constant 0 : index
    %c0_0 = arith.constant 0 : index
    %0 = vector.load %arg1[%c0, %c0_0] : memref<16x1xi32, #tpu.memory_space<vmem>>, vector<16x1xi32>
    %1 = tpu.iota {dimensions = array<i32: 1>} : vector<16x4xi32>
    %2 = vector.broadcast %0 : vector<16x1xi32> to vector<16x4xi32>
    %3 = arith.cmpi eq, %1, %2 : vector<16x4xi32>
    %4 = arith.extui %3 : vector<16x4xi1> to vector<16x4xi32>
    %5 = arith.sitofp %4 : vector<16x4xi32> to vector<16x4xf32>
    %c0_1 = arith.constant 0 : index
    %c0_2 = arith.constant 0 : index
    %6 = vector.load %arg2[%c0_1, %c0_2] : memref<16x4xf32, #tpu.memory_space<vmem>>, vector<16x4xf32>
    tpu.vector_store %arg2[%c0_1, %c0_2], %5 {strides = array<i32>} : memref<16x4xf32, #tpu.memory_space<vmem>>, vector<16x4xf32>,
    return
  }
  func.func @transform_0(%arg0: i32) -> (i32, i32) {
    %c0_i32 = arith.constant 0 : i32
    %c0_i32_0 = arith.constant 0 : i32
    return %arg0, %c0_i32 : i32, i32
  }
  func.func @transform_1(%arg0: i32) -> (i32, i32) {
    %c0_i32 = arith.constant 0 : i32
    %c0_i32_0 = arith.constant 0 : i32
    return %arg0, %c0_i32 : i32, i32
  }
}

</mosaic_0001>

<bundles_post_ra>
// kernel: tpu_custom_call.1
= control target key start
LH: loop header
LB: loop body
LE: loop exit
PB: predicated region body
PF: predicated region fallthrough
CT: control target
= control target key end

     0   :  { %v36_v0 = vmov 0   ;;  %v10_v3 = vlaneseq  ;;  %vm24_vm0 = vcmask 31744   ;;  %v37_v6 = vmov 0.0   ;;  %s60_s0 = inlined_call_operand.vmem [shape: s32[16,1], index: 0, kind: input, shape index: {}]   ;;  %s61_s1 = inlined_call_operand.vmem [shape: f32[16,4], index: 1, kind: output, shape index: {}]  }
   0x1   :  { %35 = vset.pattern.permute.xlu0 %v36_v0  ;;  %v8_v1 = vld [vmem:[%s60_s0] sm:$0xff]  ;;  %v9_v2 = vld [vmem:[%s60_s0 + $0x8] sm:$0xff] }
   0x2   :  { %13 = vperm.xlu0 %35, %v8_v1   ;;  %v11_v4 = vand.u32 127, %v10_v3 }
   0xa   :  { %16 = vperm.xlu0 %35, %v9_v2  }
  0x74   :  { %v14_v5 = vpop.permute.xlu0 %13 }
  0x75   :  { %vm18_vm1 = vcmp.eq.s32.totalorder %v11_v4, %v14_v5 }
  0x76   :  { %v31_v7 = vsel %vm18_vm1, 1.0, %v37_v6 }
  0x77   :  { %25 = vst.msk [vmem:[%s61_s1] sm:$0xff] %vm24_vm0, %v31_v7 }
  0x7c   :  { %v17_v8 = vpop.permute.xlu0 %16 }
  0x7d   :  { %vm19_vm2 = vcmp.eq.s32.totalorder %v11_v4, %v17_v8 }
  0x7e   :  { %v32_v9 = vsel %vm19_vm2, 1.0, %v37_v6 }
  0x7f   :  { %26 = vst.msk [vmem:[%s61_s1 + $0x8] sm:$0xff] %vm24_vm0, %v32_v9 }

</bundles_post_ra>
